<compile_context>
chip_gen: v5e
topology: v5e:2x2
jax: 0.10.0
libtpu: 0.0.40
codegen_flags: <defaults>
</compile_context>

<pallas_src>
import functools

import jax
import jax.numpy as jnp
from jax.experimental import pallas as pl
from jax.experimental.pallas import tpu as pltpu


# ----------------------------------------------------------------------------
# Kernel
# ----------------------------------------------------------------------------
def _gml_kernel(g_ref, x_ref, w_ref, o_ref, h_scr, *,
                mat_pow, mat_diag, nonlin, norm_by_neighbors, approx_recip):
    # g_ref: (Bt, N, N)  x_ref: (Bt, N, C)  w_ref: (C, GS*P)
    # o_ref: (Bt, N, P)  h_scr: (GS, Bt, N, P) persistent VMEM scratch
    gi = pl.program_id(1)
    GS = h_scr.shape[0]
    P = h_scr.shape[-1]
    Bt, N, C = x_ref.shape
    cdt = x_ref.dtype

    # --- fused Linear for all GS channels, once per batch block (gi == 0) ---
    # One (Bt*N, C) @ (C, GS*P) matmul fills the MXU lane dim instead of GS
    # narrow width-P matmuls, and runs once per b-block instead of GS times.
    @pl.when(gi == 0)
    def _():
        x2d = x_ref[...].reshape(Bt * N, C)
        h_all = jnp.dot(x2d, w_ref[...],
                        preferred_element_type=jnp.float32)      # (Bt*N, GS*P) f32
        for gg in range(GS):                                     # static unroll
            h_scr[gg] = (h_all[:, gg * P:(gg + 1) * P]
                         .reshape(Bt, N, P).astype(h_scr.dtype))

    h_g = h_scr[gi]                                              # (Bt, N, P), cdt
    G = g_ref[...]                                               # (Bt, N, N), 0/1

    # --- Gprod = G^mat_pow ---------------------------------------------------
    # Keep the power chain in f32: bf16 intermediates would round walk counts
    # that exceed 256 (mat_pow >= 3, or mat_pow == 2 with N > 256).
    if mat_pow == 1:
        Gpow = G                                                 # cdt, exact 0/1
    elif mat_pow == 2:
        Gpow = jnp.einsum('bkl,blm->bkm', G, G,
                          preferred_element_type=jnp.float32)
    else:
        G32 = G.astype(jnp.float32)
        Gpow = jnp.einsum('bkl,blm->bkm', G32, G32,
                          preferred_element_type=jnp.float32)
        for _ in range(mat_pow - 2):
            Gpow = jnp.einsum('bkl,blm->bkm', G32, Gpow,
                              preferred_element_type=jnp.float32)

    if mat_diag:
        # y = diag(G^p)[:, None] * h  -- skip the [N,N] @ [N,P] matmul.
        row = jax.lax.broadcasted_iota(jnp.int32, (N, N), 0)
        col = jax.lax.broadcasted_iota(jnp.int32, (N, N), 1)
        diag = jnp.sum(jnp.where((row == col)[None], Gpow, 0),
                       axis=-1, keepdims=True)        # one nonzero term -> exact
        y = diag.astype(jnp.float32) * h_g.astype(jnp.float32)   # (Bt, N, P)
    else:
        # Single downcast of the final operand (exact while entries <= 256);
        # keep f32 operands when that rounding could be material.
        mm_dt = cdt
        if cdt != jnp.float32 and mat_pow >= 2 and N > 256:
            mm_dt = jnp.float32
        y = jnp.einsum('bkl,blp->bkp', Gpow.astype(mm_dt), h_g.astype(mm_dt),
                       preferred_element_type=jnp.float32)        # (Bt, N, P) f32

    if norm_by_neighbors:
        # clamp(G.sum(-1), min=1) on the ORIGINAL G.  Row sums of 0/1 entries
        # are exact in bf16 for N <= 256, so no full-slab f32 cast is needed.
        gsum_src = G if (G.dtype == jnp.float32 or N <= 256) else G.astype(jnp.float32)
        neigh = jnp.maximum(
            jnp.sum(gsum_src, axis=-1, keepdims=True).astype(jnp.float32), 1.0)
        y = y * pl.reciprocal(neigh, approx=approx_recip)

    if nonlin == 'leakyrelu':
        y = jnp.where(y > 0, y, 0.01 * y)             # nn.LeakyReLU default slope
    elif nonlin == 'sigmoid':
        y = jax.nn.sigmoid(y)
    elif nonlin == 'tanh':
        y = jnp.tanh(y)
    # nonlin is None -> identity

    o_ref[...] = y.astype(o_ref.dtype)


# ----------------------------------------------------------------------------
# Sizing helpers
# ----------------------------------------------------------------------------
def _round_up(v, m):
    return -(-v // m) * m


def _tile_bytes(rows, cols, itemsize):
    """VMEM bytes of one (rows, cols) 2-D slice incl. (sublane, 128) padding."""
    sub = {4: 8, 2: 16, 1: 32}.get(itemsize, 8)
    return _round_up(max(rows, 1), sub) * _round_up(max(cols, 1), 128) * itemsize


def _pick_bt(B, GS, N, C, P, itemsize, budget):
    """Largest batch tile whose padded VMEM working set fits `budget`."""
    def need(bt):
        db = 2                                               # double-buffered blocks
        blocks = (db * bt * _tile_bytes(N, N, itemsize)      # G block
                  + db * bt * _tile_bytes(N, C, itemsize)    # x block
                  + db * _tile_bytes(C, GS * P, itemsize)    # fused W block
                  + db * bt * _tile_bytes(N, P, 4))          # f32 output block
        scratch = GS * bt * _tile_bytes(N, P, itemsize)      # persistent h scratch
        temps = (_tile_bytes(bt * N, GS * P, 4)              # fused h_all (f32)
                 + 2 * bt * _tile_bytes(N, N, 4)             # G^p chain (f32)
                 + 2 * bt * _tile_bytes(N, P, 4))            # y / nonlin temps (f32)
        return blocks + scratch + temps

    if need(1) > budget:
        return 1
    lo, hi = 1, max(B, 1)
    while lo < hi:
        mid = (lo + hi + 1) // 2
        if need(mid) <= budget:
            lo = mid
        else:
            hi = mid - 1
    return lo


def _tpu_caps():
    """(per-core VMEM capacity bytes, #TensorCores per chip) -- best effort."""
    cap = None
    try:
        c = getattr(pltpu.get_tpu_info(), "vmem_capacity_bytes", None)
        if c:
            cap = int(c)
    except Exception:
        pass
    kind = ""
    try:
        kind = jax.devices()[0].device_kind.lower()
    except Exception:
        pass
    cores = 2 if "v7" in kind else 1
    if cap is None:
        cap = (128 << 20) if ("v5" in kind or "v6" in kind) else (64 << 20)
    return cap, cores


# ----------------------------------------------------------------------------
# Wrapper
# ----------------------------------------------------------------------------
def graph_mat_layer_fast_pow(G, x, W, *,
                             mat_pow=1, mat_diag=False, nonlin=None,
                             norm_by_neighbors=False, use_bf16_mxu=True,
                             approx_reciprocal=True, max_batch_tile=None):
    """G: [B, GS, N, N], x: [B, N, C], W: [GS, P, C] -> xout: [GS, B, N, P] f32."""
    if nonlin not in (None, 'leakyrelu', 'sigmoid', 'tanh'):
        raise ValueError(f'unknown nonlin {nonlin}')
    B, GS, N, _ = G.shape
    _, _, C = x.shape
    _, P, _ = W.shape
    # TODO(synk): dropout is a train-time op (no-op in eval) and is not implemented.
    # TODO(synk): agg_func (reduction over the GS axis) is left to the caller.
    # TODO(synk): use_bias=False assumed (the module default); no bias add.

    cdt = jnp.bfloat16 if use_bf16_mxu else jnp.float32
    itemsize = 2 if use_bf16_mxu else 4

    # Fused, pre-transposed weights: [C, GS*P] with W[g].T in columns [g*P,(g+1)*P).
    # No per-channel lane padding -> no wasted Linear FLOPs / output writeback.
    Wf = jnp.transpose(W, (2, 0, 1)).reshape(C, GS * P).astype(cdt)

    # Generation-aware VMEM sizing.
    cap, cores = _tpu_caps()
    if cap >= (100 << 20):          # v5e / v6e: 128 MiB physical VMEM
        budget, vmem_limit = 56 << 20, 96 << 20
    else:                           # v7x (64 MiB per TensorCore) or unknown
        budget, vmem_limit = 20 << 20, 36 << 20

    Bt = _pick_bt(B, GS, N, C, P, itemsize, budget)
    if max_batch_tile is not None:
        Bt = max(1, min(Bt, int(max_batch_tile)))
    nb = -(-B // Bt)
    # v7x load balance: prefer an even number of batch blocks (the "parallel"
    # axis is split across 2 TensorCores) as long as no block is pure padding.
    if cores >= 2 and nb > 1 and nb % 2 == 1:
        bt2 = -(-B // (nb + 1))
        if (nb + 1) * bt2 - B < bt2:
            Bt, nb = bt2, nb + 1
    Bpad = nb * Bt

    # Relayout G -> [GS, B, N, N]: each grid step's G block is one contiguous
    # Bt*N*N slab (single DMA descriptor).  Pad B with zeros if needed.
    Gr = jnp.transpose(G, (1, 0, 2, 3)).astype(cdt)
    xc = x.astype(cdt)
    if Bpad != B:
        Gr = jnp.pad(Gr, ((0, 0), (0, Bpad - B), (0, 0), (0, 0)))
        xc = jnp.pad(xc, ((0, Bpad - B), (0, 0), (0, 0)))

    kernel = functools.partial(
        _gml_kernel, mat_pow=mat_pow, mat_diag=mat_diag, nonlin=nonlin,
        norm_by_neighbors=norm_by_neighbors, approx_recip=approx_reciprocal)

    # Advisory cost estimate for XLA scheduling around the custom call.
    flops = 2 * Bpad * N * C * GS * P                          # fused Linear
    flops += 2 * GS * Bpad * max(mat_pow - 1, 0) * N * N * N   # G^p chain
    flops += (GS * Bpad * N * P) if mat_diag else (2 * GS * Bpad * N * N * P)
    transcend = GS * Bpad * N * P if nonlin in ('sigmoid', 'tanh') else 0
    bytes_accessed = ((Bpad * GS * N * N + Bpad * N * C + C * GS * P) * itemsize
                      + GS * Bpad * N * P * 4)
    cost = pl.CostEstimate(flops=int(flops), transcendentals=int(transcend),
                           bytes_accessed=int(bytes_accessed))

    out = pl.pallas_call(
        kernel,
        out_shape=jax.ShapeDtypeStruct((GS, Bpad, N, P), jnp.float32),
        grid_spec=pltpu.PrefetchScalarGridSpec(
            num_scalar_prefetch=0,
            # b outer ("parallel": sharded across TensorCores), g inner
            # ("arbitrary": the fused-Linear scratch carries state across g,
            #  and x/W blocks stay resident across the GS sweep).
            grid=(nb, GS),
            in_specs=[
                pl.BlockSpec((None, Bt, N, N), lambda b, g: (g, b, 0, 0)),  # G
                pl.BlockSpec((Bt, N, C),       lambda b, g: (b, 0, 0)),     # x
                pl.BlockSpec((C, GS * P),      lambda b, g: (0, 0)),        # W fused
            ],
            out_specs=pl.BlockSpec((None, Bt, N, P), lambda b, g: (g, b, 0, 0)),
            scratch_shapes=[pltpu.VMEM((GS, Bt, N, P), cdt)],
        ),
        compiler_params=pltpu.CompilerParams(
            dimension_semantics=("parallel", "arbitrary"),
            vmem_limit_bytes=vmem_limit),
        cost_estimate=cost,
    )(Gr, xc, Wf)

    if Bpad != B:
        out = out[:, :B]
    return out


# ----------------------------------------------------------------------------
# Pure-JAX reference mirroring the PyTorch forward
# ----------------------------------------------------------------------------
def _reference(G, x, W, *, mat_pow, mat_diag, nonlin, norm_by_neighbors):
    B, GS, N, _ = G.shape
    Gprod = G
    for _ in range(mat_pow - 1):
        Gprod = jnp.einsum('ijkl,ijlm->ijkm', G, Gprod)
    if mat_diag:
        Gprod = jnp.eye(N)[None, None] * Gprod
    multi_x = jnp.stack([x @ W[g].T for g in range(GS)], 0)      # [GS, B, N, P]
    xout = jnp.einsum('ijkl,jilm->jikm', Gprod, multi_x)         # [GS, B, N, P]
    if norm_by_neighbors:
        neigh = jnp.maximum(jnp.transpose(G.sum(-1), (1, 0, 2)), 1.0)  # [GS, B, N]
        xout = xout / neigh[..., None]
    if nonlin == 'leakyrelu':
        xout = jnp.where(xout > 0, xout, 0.01 * xout)
    elif nonlin == 'sigmoid':
        xout = jax.nn.sigmoid(xout)
    elif nonlin == 'tanh':
        xout = jnp.tanh(xout)
    return xout


if __name__ == "__main__":
    # Small deterministic example consistent with the module's forward.
    B, GS, N, C, P = 2, 2, 16, 32, 32

    key = jax.random.PRNGKey(0)
    kg, kx, kw = jax.random.split(key, 3)
    # Adjacency-like, non-negative G.
    G = (jax.random.uniform(kg, (B, GS, N, N)) > 0.6).astype(jnp.float32)
    x = jax.random.normal(kx, (B, N, C), dtype=jnp.float32)
    # Deterministic Linear weights (PyTorch Linear weight shape: [P, C]).
    W = jax.random.normal(kw, (GS, P, C), dtype=jnp.float32) * (1.0 / jnp.sqrt(C))

    cfg = dict(mat_pow=2, mat_diag=False, nonlin='leakyrelu',
               norm_by_neighbors=True)
    ref = _reference(G, x, W, **cfg)

    # 1) pure-f32 path (exact reciprocal): tight check against the reference.
    out_f32 = jax.block_until_ready(graph_mat_layer_fast_pow(
        G, x, W, use_bf16_mxu=False, approx_reciprocal=False, **cfg))
    assert out_f32.shape == (GS, B, N, P)
    assert jnp.allclose(out_f32, ref, atol=1e-4, rtol=1e-4), "f32 mismatch vs reference"

    # 2) bf16-MXU default path: relaxed tolerance (bf16 operand rounding,
    #    f32 accumulation; G^p chain stays in f32).
    out_bf16 = jax.block_until_ready(graph_mat_layer_fast_pow(G, x, W, **cfg))
    assert jnp.allclose(out_bf16, ref, atol=5e-2, rtol=5e-2), "bf16 mismatch vs reference"

    # 3) mat_diag short-circuit + mat_pow=3 (f32 power-chain path).
    cfg2 = dict(mat_pow=3, mat_diag=True, nonlin='tanh', norm_by_neighbors=False)
    out_diag = jax.block_until_ready(graph_mat_layer_fast_pow(
        G, x, W, use_bf16_mxu=False, approx_reciprocal=False, **cfg2))
    ref_diag = _reference(G, x, W, **cfg2)
    assert jnp.allclose(out_diag, ref_diag, atol=1e-4, rtol=1e-4), "mat_diag mismatch"

    # 4) non-divisor batch tile: exercises B padding + multi-block grid.
    B3 = 3
    kg3, kx3 = jax.random.split(jax.random.PRNGKey(1), 2)
    G3 = (jax.random.uniform(kg3, (B3, GS, N, N)) > 0.6).astype(jnp.float32)
    x3 = jax.random.normal(kx3, (B3, N, C), dtype=jnp.float32)
    cfg3 = dict(mat_pow=1, mat_diag=False, nonlin='sigmoid', norm_by_neighbors=True)
    out_pad = jax.block_until_ready(graph_mat_layer_fast_pow(
        G3, x3, W, use_bf16_mxu=False, approx_reciprocal=False,
        max_batch_tile=2, **cfg3))
    ref_pad = _reference(G3, x3, W, **cfg3)
    assert out_pad.shape == (GS, B3, N, P)
    assert jnp.allclose(out_pad, ref_pad, atol=1e-4, rtol=1e-4), "padded-batch mismatch"

    print("KERNEL_OK")
</pallas_src>

<mosaic_0001>
module attributes {stable_mosaic.version = 11 : i64} {
  func.func @_gml_kernel(%arg0: i32, %arg1: i32, %arg2: memref<1x2x16x16xf32, #tpu.memory_space<vmem>>, %arg3: memref<2x16x32xf32, #tpu.memory_space<vmem>>, %arg4: memref<32x64xf32, #tpu.memory_space<vmem>>, %arg5: memref<1x2x16x32xf32, #tpu.memory_space<vmem>>, %arg6: memref<2x2x16x32xf32, #tpu.memory_space<vmem>>) attributes {dimension_semantics = [#tpu.dimension_semantics<parallel>, #tpu.dimension_semantics<arbitrary>], iteration_bounds = array<i64: 1, 2>, scalar_prefetch = 0 : i64, scratch_operands = 1 : i64, tpu.core_type = #tpu.core_type<tc>, window_params = [{transform_indices = @transform_0, window_bounds = array<i64: 1, 2, 16, 16>}, {transform_indices = @transform_1, window_bounds = array<i64: 2, 16, 32>}, {pipeline_mode = #tpu.pipeline_mode<synchronous>, transform_indices = @transform_2, window_bounds = array<i64: 32, 64>}, {transform_indices = @transform_3, window_bounds = array<i64: 1, 2, 16, 32>}]} {
    %c0_i32 = arith.constant 0 : i32
    %0 = arith.cmpi eq, %arg1, %c0_i32 : i32
    %1 = arith.extui %0 : i1 to i32
    %c0_i32_0 = arith.constant 0 : i32
    %2 = arith.cmpi ne, %1, %c0_i32_0 : i32
    scf.if %2 {
      %c0_16 = arith.constant 0 : index
      %c0_17 = arith.constant 0 : index
      %c0_18 = arith.constant 0 : index
      %25 = vector.load %arg3[%c0_16, %c0_17, %c0_18] : memref<2x16x32xf32, #tpu.memory_space<vmem>>, vector<2x16x32xf32>
      %26 = vector.shape_cast %25 : vector<2x16x32xf32> to vector<32x32xf32>
      %c0_19 = arith.constant 0 : index
      %c0_20 = arith.constant 0 : index
      %27 = vector.load %arg4[%c0_19, %c0_20] : memref<32x64xf32, #tpu.memory_space<vmem>>, vector<32x64xf32>
      %cst_21 = arith.constant dense<0.000000e+00> : vector<32x64xf32>
      %28 = tpu.matmul %26, %27, %cst_21 {dimension_numbers = #tpu.dot_dimension_numbers<[1], [0], [0], [1], [0, 0, 1, 1], [], []>} : vector<32x32xf32>, vector<32x64xf32>, vector<32x64xf32> -> vector<32x64xf32>
      %29 = vector.extract_strided_slice %28 {offsets = [0, 0], sizes = [32, 32], strides = [1, 1]} : vector<32x64xf32> to vector<32x32xf32>
      %30 = vector.shape_cast %29 : vector<32x32xf32> to vector<2x16x32xf32>
      %c0_22 = arith.constant 0 : index
      %c0_23 = arith.constant 0 : index
      %c0_24 = arith.constant 0 : index
      %c0_25 = arith.constant 0 : index
      %31 = vector.load %arg6[%c0_22, %c0_23, %c0_24, %c0_25] : memref<2x2x16x32xf32, #tpu.memory_space<vmem>>, vector<1x2x16x32xf32>
      %32 = vector.shape_cast %31 : vector<1x2x16x32xf32> to vector<2x16x32xf32>
      %33 = vector.shape_cast %30 : vector<2x16x32xf32> to vector<1x2x16x32xf32>
      tpu.vector_store %arg6[%c0_22, %c0_23, %c0_24, %c0_25], %33 {strides = array<i32>} : memref<2x2x16x32xf32, #tpu.memory_space<vmem>>, vector<1x2x16x32xf32>,
      %34 = vector.extract_strided_slice %28 {offsets = [0, 32], sizes = [32, 32], strides = [1, 1]} : vector<32x64xf32> to vector<32x32xf32>
      %35 = vector.shape_cast %34 : vector<32x32xf32> to vector<2x16x32xf32>
      %c1 = arith.constant 1 : index
      %c0_26 = arith.constant 0 : index
      %c0_27 = arith.constant 0 : index
      %c0_28 = arith.constant 0 : index
      %36 = vector.load %arg6[%c1, %c0_26, %c0_27, %c0_28] : memref<2x2x16x32xf32, #tpu.memory_space<vmem>>, vector<1x2x16x32xf32>
      %37 = vector.shape_cast %36 : vector<1x2x16x32xf32> to vector<2x16x32xf32>
      %38 = vector.shape_cast %35 : vector<2x16x32xf32> to vector<1x2x16x32xf32>
      tpu.vector_store %arg6[%c1, %c0_26, %c0_27, %c0_28], %38 {strides = array<i32>} : memref<2x2x16x32xf32, #tpu.memory_space<vmem>>, vector<1x2x16x32xf32>,
    } else {
    }
    %3 = arith.index_cast %arg1 : i32 to index
    %c0 = arith.constant 0 : index
    %c0_1 = arith.constant 0 : index
    %c0_2 = arith.constant 0 : index
    %4 = vector.load %arg6[%3, %c0, %c0_1, %c0_2] : memref<2x2x16x32xf32, #tpu.memory_space<vmem>>, vector<1x2x16x32xf32>
    %5 = vector.shape_cast %4 : vector<1x2x16x32xf32> to vector<2x16x32xf32>
    %c0_3 = arith.constant 0 : index
    %c0_4 = arith.constant 0 : index
    %c0_5 = arith.constant 0 : index
    %c0_6 = arith.constant 0 : index
    %6 = vector.load %arg2[%c0_3, %c0_4, %c0_5, %c0_6] : memref<1x2x16x16xf32, #tpu.memory_space<vmem>>, vector<1x2x16x16xf32>
    %7 = vector.shape_cast %6 : vector<1x2x16x16xf32> to vector<2x16x16xf32>
    "tpu.trace_start"() <{level = 10 : i32, message = "bkl,blm->bkm"}> : () -> ()
    %cst = arith.constant dense<0.000000e+00> : vector<2x16x16xf32>
    %8 = tpu.matmul %7, %7, %cst {dimension_numbers = #tpu.dot_dimension_numbers<[2], [1], [1], [2], [0, 0, 0, 1, 1, 2], [0], [0]>} : vector<2x16x16xf32>, vector<2x16x16xf32>, vector<2x16x16xf32> -> vector<2x16x16xf32>
    "tpu.trace_stop"() : () -> ()
    "tpu.trace_start"() <{level = 10 : i32, message = "bkl,blp->bkp"}> : () -> ()
    %cst_7 = arith.constant dense<0.000000e+00> : vector<2x16x32xf32>
    %9 = tpu.matmul %8, %5, %cst_7 {dimension_numbers = #tpu.dot_dimension_numbers<[2], [1], [1], [2], [0, 0, 0, 1, 1, 2], [0], [0]>} : vector<2x16x16xf32>, vector<2x16x32xf32>, vector<2x16x32xf32> -> vector<2x16x32xf32>
    "tpu.trace_stop"() : () -> ()
    %cst_8 = arith.constant dense<0.000000e+00> : vector<2x16xf32>
    %10 = vector.multi_reduction <add>, %7, %cst_8 [2] : vector<2x16x16xf32> to vector<2x16xf32>
    %11 = vector.shape_cast %10 : vector<2x16xf32> to vector<2x16x1xf32>
    %cst_9 = arith.constant 1.000000e+00 : f32
    %12 = vector.broadcast %cst_9 : f32 to vector<2x16x1xf32>
    %13 = arith.maximumf %11, %12 : vector<2x16x1xf32>
    %14 = tpu.reciprocal %13 : vector<2x16x1xf32> -> vector<2x16x1xf32>
    %15 = vector.broadcast %14 : vector<2x16x1xf32> to vector<2x16x32xf32>
    %16 = arith.mulf %9, %15 : vector<2x16x32xf32>
    %cst_10 = arith.constant 0.000000e+00 : f32
    %17 = vector.broadcast %cst_10 : f32 to vector<2x16x32xf32>
    %18 = arith.cmpf ogt, %16, %17 : vector<2x16x32xf32>
    %cst_11 = arith.constant 0.00999999977 : f32
    %19 = vector.broadcast %cst_11 : f32 to vector<2x16x32xf32>
    %20 = arith.mulf %19, %16 : vector<2x16x32xf32>
    %21 = arith.select %18, %16, %20 : vector<2x16x32xi1>, vector<2x16x32xf32>
    %c0_12 = arith.constant 0 : index
    %c0_13 = arith.constant 0 : index
    %c0_14 = arith.constant 0 : index
    %c0_15 = arith.constant 0 : index
    %22 = vector.load %arg5[%c0_12, %c0_13, %c0_14, %c0_15] : memref<1x2x16x32xf32, #tpu.memory_space<vmem>>, vector<1x2x16x32xf32>
    %23 = vector.shape_cast %22 : vector<1x2x16x32xf32> to vector<2x16x32xf32>
    %24 = vector.shape_cast %21 : vector<2x16x32xf32> to vector<1x2x16x32xf32>
    tpu.vector_store %arg5[%c0_12, %c0_13, %c0_14, %c0_15], %24 {strides = array<i32>} : memref<1x2x16x32xf32, #tpu.memory_space<vmem>>, vector<1x2x16x32xf32>,
    return
  }
  func.func @transform_0(%arg0: i32, %arg1: i32) -> (i32, i32, i32, i32) {
    %c0_i32 = arith.constant 0 : i32
    %c0_i32_0 = arith.constant 0 : i32
    %c0_i32_1 = arith.constant 0 : i32
    return %arg1, %arg0, %c0_i32, %c0_i32_0 : i32, i32, i32, i32
  }
  func.func @transform_1(%arg0: i32, %arg1: i32) -> (i32, i32, i32) {
    %c0_i32 = arith.constant 0 : i32
    %c0_i32_0 = arith.constant 0 : i32
    %c0_i32_1 = arith.constant 0 : i32
    return %arg0, %c0_i32, %c0_i32_0 : i32, i32, i32
  }
  func.func @transform_2(%arg0: i32, %arg1: i32) -> (i32, i32) {
    %c0_i32 = arith.constant 0 : i32
    %c0_i32_0 = arith.constant 0 : i32
    %c0_i32_1 = arith.constant 0 : i32
    return %c0_i32, %c0_i32_0 : i32, i32
  }
  func.func @transform_3(%arg0: i32, %arg1: i32) -> (i32, i32, i32, i32) {
    %c0_i32 = arith.constant 0 : i32
    %c0_i32_0 = arith.constant 0 : i32
    %c0_i32_1 = arith.constant 0 : i32
    return %arg1, %arg0, %c0_i32, %c0_i32_0 : i32, i32, i32, i32
  }
}

</mosaic_0001>

<bundles_post_ra>
// kernel: tpu_custom_call.1
= control target key start
LH: loop header
LB: loop body
LE: loop exit
PB: predicated region body
PF: predicated region fallthrough
CT: control target
= control target key end

     0   :  { %8 = vsyncpa [#allocation4], 0  ;;  %s1282_s0 = inlined_call_operand.hbm [shape: f32[2,2,16,16], index: 0, kind: input, shape index: {}]   ;;  %s1283_s1 = inlined_call_operand.hbm [shape: f32[2,16,32], index: 1, kind: input, shape index: {}]   ;;  %s1284_s2 = inlined_call_operand.hbm [shape: f32[32,64], index: 2, kind: input, shape index: {}]   ;;  %s1285_s3 = inlined_call_operand.hbm [shape: f32[2,2,16,32], index: 3, kind: output, shape index: {}]  }
   0x1   :  { %10 = vsyncpa [#allocation4 + $0x1], 0 }
   0x2   :  { %11 = vsyncpa [#allocation7], 0 }
   0x3   :  { %12 = vsyncpa [#allocation5], 0 }
   0x4   :  { %14 = vsyncpa [#allocation5 + $0x1], 0  ;;  %s1031_s12 = smov 0   ;;  %s1033_s13 = smov 0  }
   0x5   :  { %s1035_s14 = smov 0   ;;  %s1037_s15 = smov 0  }
   0x6   :  { %s1039_s16 = smov 0   ;;  %s1041_s17 = smov 0  }
   0x7 LB: > { %s683_s18 = sadd.s32 4294967295, %s1002_s17   ;;  %s684_s19 = sadd.s32 4294967294, %s1002_s17   ;;  %s1002_s17 = sphi %s1041_s17, %s20_s17   ;;  %s998_s16 = sphi %s1039_s16, %s1301_s16   ;;  %s994_s15 = sphi %s1037_s15, %s1300_s15   ;;  %s990_s14 = sphi %s1035_s14, %s1299_s14   ;;  %s986_s13 = sphi %s1033_s13, %s1298_s13   ;;  %s982_s12 = sphi %s1031_s12, %s1297_s12  }
   0x8   : > { %p54_p0 = scmp.ne.s32.totalorder %s986_s13, %s982_s12  ;;  %p1067_p1 = scmp.eq.s32.totalorder %s683_s18, 0 }
   0x9   : > { %p133_p2 = scmp.eq.s32.totalorder %s684_s19, 1  ;;  %p685_p4 = scmp.ge.s32.totalorder %s1002_s17, 1 }
   0xa   : > { %p1073_p3 = por %p1067_p1, %p54_p0  ;;  %p140_p6 = scmp.lt.s32.totalorder %s1002_s17, 3 }
   0xb   : > { %p1078_p5 = por %p133_p2, %p54_p0  ;;  %s155_s25 = sshll.u32 %s1283_s1, 4  ;;  %s156_s25 = int_to_ptr.hbm [resolvable:$true] %s155_s25 }
   0xc   : > { %p1086_p7 = pnand %p685_p4, %p140_p6  ;;  %s1004_s27 = smov [#allocation6]  }
   0xd   : > { %s157_s28 = sshll.u32 %s1004_s27, 4  ;;  %p688_p10 = scmp.ge.s32.totalorder %s1002_s17, 2  ;;  %s158_s28 = int_to_ptr.vmem [resolvable:$true] %s157_s28 }
   0xe   : > { %p742_p8 = pneg %p1086_p7  ;;  %s169_s4 = sshll.u32 %s1284_s2, 4  ;;  %s170_s4 = int_to_ptr.hbm [resolvable:$true] %s169_s4 }
   0xf   : > { %s1005_s5 = smov 128   ;;  %s1006_s6 = smov 8  }
  0x10   : > { %p743_p9 = pnand %p742_p8, %p1067_p1  ;;  %s1007_s7 = smov [#allocation8]  }
  0x11   : > { %s171_s8 = sshll.u32 %s1007_s7, 4  ;;  %p127_p11 = scmp.eq.s32.totalorder %s683_s18, 1  ;;  %s172_s8 = int_to_ptr.vmem [resolvable:$true] %s171_s8 }
  0x12   : > { %745 = dma.hbm_to_vmem [thread:$0]  (!%p743_p9), %s156_s25, 512, %s158_s28, [#allocation7], %s1005_s5, %s1005_s5, %s1006_s6  }
  0x13   : > { %748 = dma.hbm_to_vmem [thread:$0]  (!%p743_p9), %s170_s4, 512, %s172_s8, [#allocation7], %s1005_s5, %s1005_s5, %s1006_s6  }
  0x14   : > { %s29_s9 = sadd.s32 1, %s998_s16  ;;  %s41_s10 = sadd.s32 1, %s990_s14 }
  0x15   : > { %p30_p12 = scmp.ge.s32.totalorder %s29_s9, 2  ;;  %p48_p13 = scmp.ne.s32.totalorder %s990_s14, %s986_s13 }
  0x16   : > { %p49_p0 = scmp.eq.s32.totalorder %s1002_s17, 0  ;;  %p759_p4 = scmp.lt.s32.totalorder %s1002_s17, 2 }
  0x17   : > { %s1303_s9 = smov (%p30_p12, %s29_s9), 0  ;;  %p1113_p2 = por %p127_p11, %p48_p13 }
  0x18   : > { %s36_s19 = ssub.s32 %s998_s16, %s1303_s9  ;;  %s185_s23 = sand.u32 1, %s990_s14  }
  0x19   : > { %p39_p6 = scmp.eq.s32.totalorder %s36_s19, 0  ;;  %p50_p8 = por %p49_p0, %p48_p13 }
  0x1a   : > { %s689_s24 = sshll.u32 %s185_s23, 5  ;;  %s716_s18 = sshll.u32 %s998_s16, 5 }
  0x1b   : > { %s1123_s25 = scalar_select %p39_p6, %s990_s14, %s41_s10  }
  0x1c   : > { %s197_s29 = scalar_lea.hbm %s1282_s0, %s716_s18  ;;  %s189_s4 = scalar_lea.vmem [#allocation3], %s689_s24 }
  0x1d   : > { %s198_s30 = sshll.u32 %s197_s29, 4  ;;  %s200_s7 = sshll.u32 %s189_s4, 4  ;;  %s199_s30 = int_to_ptr.hbm [resolvable:$true] %s198_s30  ;;  %s201_s7 = int_to_ptr.vmem [resolvable:$true] %s200_s7 }
  0x1e   : > { %p750_p9 = pnand %p759_p4, %p50_p8  ;;  %s186_s8 = scalar_lea.sflag [#allocation4], %s185_s23 }
  0x1f   : > { %212 = sbr.rel (%p1086_p7) target bundleno = 590 (0x24e), region = 32  ;;  %s1136_s10 = sand.u32 (!%p1086_p7), 1, %s986_s13  }
  0x20   : > { %752 = dma.hbm_to_vmem [thread:$0]  (!%p750_p9), %s199_s30, 512, %s201_s7, %s186_s8, %s1005_s5, %s1005_s5, %s1006_s6  }
  0x21   : > { %s693_s19 = sshll.u32 (!%p1086_p7), %s1136_s10, 5  ;;  %s215_s24 = scalar_lea.sflag (!%p1086_p7), [#allocation4], %s1136_s10 }
  0x22   : > { %s1140_s18 = scalar_lea.vmem (!%p1086_p7), [#allocation3], %s693_s19 }
  0x24   : > { %969 = dma.done.wait (%p1073_p3), %s215_s24, 512  }
  0x25   : > { %971 = vsyncadd (%p1073_p3), %s215_s24, 4294966784 }
  0x26   : > { %973 = dma.done.wait (%p1067_p1), [#allocation7], 1024  }
  0x27   : > { %975 = vsyncadd (%p1067_p1), [#allocation7], 4294966272  ;;  %s1150_s26 = scalar_lea.vmem [#allocation9], %s693_s19  ;;  %p697_p7 = scmp.ne.s32.totalorder %s994_s15, 0 }
  0x28   : > { %s1008_s20 = smov (!%p697_p7), 96  }
  0x29   : > { %258 = sbr.rel (%p697_p7) target bundleno = 310 (0x136), region = 48 }
  0x2e   : > { %v266_v0 = vld [vmem:[#allocation8 + $0x18] sm:$0xff]  ;;  %v265_v1 = vld [vmem:[#allocation8 + $0x10] sm:$0xff]  ;;  %v264_v2 = vld [vmem:[#allocation8 + $0x8] sm:$0xff]  ;;  %vm267_vm0 = vcmask 261120  }
  0x2f   : > { %719 = vmatpush.msra.mxu2 %v266_v0  ;;  %292 = vmatpush.msra.mxu0 %v266_v0  ;;  %v263_v3 = vld [vmem:[#allocation8] sm:$0xff]  ;;  %v261_v4 = vld [vmem:[#allocation6 + $0x10] sm:$0xff]  ;;  %v262_v6 = vld [vmem:[#allocation6 + $0x18] sm:$0xff] }
  0x30   : > { %720 = vmatpush.msra.mxu3 %v266_v0  ;;  %718 = vmatpush.msra.mxu1 %v266_v0  ;;  %v259_v5 = vld [vmem:[#allocation6] sm:$0xff]  ;;  %v260_v7 = vld [vmem:[#allocation6 + $0x8] sm:$0xff] }
  0x31   : > { %722 = vmatpush.msra.mxu2 %v265_v1  ;;  %293 = vmatpush.msra.mxu0 %v265_v1 }
  0x32   : > { %723 = vmatpush.msra.mxu3 %v265_v1  ;;  %721 = vmatpush.msra.mxu1 %v265_v1 }
  0x33   : > { %725 = vmatpush.msra.mxu2 %v264_v2  ;;  %294 = vmatpush.msra.mxu0 %v264_v2 }
  0x34   : > { %726 = vmatpush.msra.mxu3 %v264_v2  ;;  %724 = vmatpush.msra.mxu1 %v264_v2 }
  0x35   : > { %728 = vmatpush.msra.mxu2 %v263_v3  ;;  %295 = vmatpush.msra.mxu0 %v263_v3 }
  0x36   : > { %700 = vmatmul.msk.f32.vlgmr.msra.gmra.mxu2 %vm267_vm0, %v261_v4  ;;  %698 = vmatmul.msk.f32.vlgmr.msra.gmra.mxu0 %vm267_vm0, %v259_v5 }
  0x37   : > { %729 = vmatpush.msra.mxu3 %v263_v3  ;;  %727 = vmatpush.msra.mxu1 %v263_v3 }
  0x38   : > { %701 = vmatmul.msk.f32.vlgmr.msra.gmra.mxu3 %vm267_vm0, %v262_v6  ;;  %699 = vmatmul.msk.f32.vlgmr.msra.gmra.mxu1 %vm267_vm0, %v260_v7 }
  0xb3   : > { %v297_v8 = vpop.f32.mrf.mxu0 }
  0xb4   : > { %309 = vst.msk [vmem:[#allocation2] sm:$0xff] %vm267_vm0, %v297_v8  ;;  %317 = vrot.lane.b32.xlu0 %v297_v8, %s1008_s20 }
  0xb5   : > { %v300_v9 = vpop.f32.mrf.mxu1 }
  0xb6   : > { %310 = vst.msk [vmem:[#allocation2 + $0x8] sm:$0xff] %vm267_vm0, %v300_v9 }
  0xb9   : > { %v303_v10 = vpop.f32.mrf.mxu2 }
  0xba   : > { %311 = vst.msk [vmem:[#allocation2 + $0x10] sm:$0xff] %vm267_vm0, %v303_v10  ;;  %321 = vrot.lane.b32.xlu1 %v303_v10, %s1008_s20 }
  0xbb   : > { %v306_v11 = vpop.f32.mrf.mxu3 }
  0xbc   : > { %312 = vst.msk [vmem:[#allocation2 + $0x18] sm:$0xff] %vm267_vm0, %v306_v11  ;;  %319 = vrot.lane.b32.xlu0 %v300_v9, %s1008_s20 }
  0xc2   : > { %323 = vrot.lane.b32.xlu1 %v306_v11, %s1008_s20 }
 0x126   : > { %v318_v12 = vpop.permute.xlu0 %317 }
 0x127   : > { %330 = vst.msk [vmem:[#allocation2 + $0x20] sm:$0xff] %vm267_vm0, %v318_v12 }
 0x12c   : > { %v322_v13 = vpop.permute.xlu1 %321 }
 0x12d   : > { %332 = vst.msk [vmem:[#allocation2 + $0x30] sm:$0xff] %vm267_vm0, %v322_v13 }
 0x12e   : > { %v320_v14 = vpop.permute.xlu0 %319 }
 0x12f   : > { %331 = vst.msk [vmem:[#allocation2 + $0x28] sm:$0xff] %vm267_vm0, %v320_v14 }
 0x134   : > { %v324_v15 = vpop.permute.xlu1 %323 }
 0x135   : > { %333 = vst.msk [vmem:[#allocation2 + $0x38] sm:$0xff] %vm267_vm0, %v324_v15 }
 0x136 PF: > { %v341_v16 = vld [vmem:[%s1140_s18 + $0x8] sm:$0xff]  ;;  %v343_v17 = vld [vmem:[%s1140_s18 + $0x18] sm:$0xff]  ;;  %v340_v18 = vld [vmem:[%s1140_s18] sm:$0xff]  ;;  %vm344_vm1 = vcmask 130048   ;;  %s702_s21 = sshll.u32 %s994_s15, 5  ;;  %vm549_vm15 = vcmask 261120  }
 0x137   : > { %365 = vmatpush.msra.mxu0 %v341_v16  ;;  %394 = vmatpush.msra.mxu1 %v343_v17  ;;  %v342_v19 = vld [vmem:[%s1140_s18 + $0x10] sm:$0xff]  ;;  %v461_v20 = vsel %vm344_vm1, %v340_v18, 0.0  ;;  %s335_s5 = scalar_lea.vmem [#allocation2], %s702_s21  ;;  %v464_v24 = vsel %vm344_vm1, %v341_v16, 0.0  ;;  %v470_v25 = vsel %vm344_vm1, %v343_v17, 0.0  ;;  %s569_s27 = scalar_lea.hbm %s1285_s3, %s702_s21 }
 0x138   : > { %v467_v21 = vsel %vm344_vm1, %v342_v19, 0.0  ;;  %462 = vadd.xlane.f32.xlu0 %v461_v20  ;;  %s572_s28 = sshll.u32 %s569_s27, 4  ;;  %s570_s15 = sshll.u32 %s1150_s26, 4  ;;  %s1240_s28 = int_to_ptr.hbm [resolvable:$true] %s572_s28  ;;  %s571_s15 = int_to_ptr.vmem [resolvable:$true] %s570_s15 }
 0x139   : > { %366 = vmatpush.msra.mxu0 %v340_v18  ;;  %395 = vmatpush.msra.mxu1 %v342_v19  ;;  %s555_s29 = scalar_lea.sflag [#allocation5], %s1136_s10  ;;  %s930_s30 = sshra.s32 %s1240_s28, 4  ;;  %s931_s30 = int_to_ptr.hbm [resolvable:$true] %s930_s30 }
 0x13a   : > { %703 = vmatmul.msk.f32.vlgmr.msra.gmra.mxu0 %vm344_vm1, %v340_v18  ;;  %705 = vmatmul.msk.f32.vlgmr.msra.gmra.mxu1 %vm344_vm1, %v342_v19  ;;  %s932_s4 = scalar_lea.hbm %s931_s30, 32  ;;  %s936_s19 = scalar_lea.hbm %s1285_s3, 64 }
 0x13b   : > { %468 = vadd.xlane.f32.xlu1 %v467_v21  ;;  %p933_p1 = scmp.ne.s32.totalorder %s931_s30, %s932_s4  ;;  %p937_p12 = scmp.lt.s32.totalorder %s931_s30, %s1285_s3 }
 0x13c   : > { %v337_v22 = vld [vmem:[%s335_s5 + $0x8] sm:$0xff]  ;;  %v339_v23 = vld [vmem:[%s335_s5 + $0x18] sm:$0xff]  ;;  %v336_v26 = vld [vmem:[%s335_s5] sm:$0xff]  ;;  %p938_p13 = scmp.lt.s32.totalorder %s936_s19, %s932_s4 }
 0x13d   : > { %423 = vmatpush.msra.mxu2 %v337_v22  ;;  %452 = vmatpush.msra.mxu3 %v339_v23  ;;  %v338_v27 = vld [vmem:[%s335_s5 + $0x10] sm:$0xff]  ;;  %p934_p3 = pnand %p933_p1, %p1113_p2 }
 0x13e   : > { %p939_p0 = por %p938_p13, %p937_p12 }
 0x13f   : > { %424 = vmatpush.msra.mxu2 %v336_v26  ;;  %453 = vmatpush.msra.mxu3 %v338_v27  ;;  %p935_p11 = pneg %p934_p3 }
 0x140   : > { %465 = vadd.xlane.f32.xlu0 %v464_v24 }
 0x141   : > { %p940_p4 = pnand %p939_p0, %p935_p11 }
 0x142   : > { %704 = vmatmul.msk.f32.gmra.mxu0 %vm344_vm1, %v341_v16  ;;  %706 = vmatmul.msk.f32.gmra.mxu1 %vm344_vm1, %v343_v17 }
 0x143   : > { %471 = vadd.xlane.f32.xlu1 %v470_v25 }
 0x1ab   : > { %v463_v32 = vpop.xlane.xlu0 %462 }
 0x1ac   : > { %v473_v34 = vmax.f32 %v463_v32, 1.0 }
 0x1ae   : > { %v469_v33 = vpop.xlane.xlu1 %468  ;;  %818 = vrcp.f32 %v473_v34  ;;  %vm482_vm2 = vweird.f32 %v473_v34  ;;  %v488_v53 = vand.u32 2147483648, %v473_v34  ;;  %v486_v56 = vand.u32 2147483647, %v473_v34 }
 0x1af   : > { %v475_v35 = vmax.f32 %v469_v33, 1.0 }
 0x1b0   : > { %v489_v62 = vor.u32 1.1754944e-38, %v488_v53  ;;  %vm487_vm8 = vcmp.eq.f32.partialorder %v486_v56, 8.507059e+37 }
 0x1b1   : > { %820 = vrcp.f32 %v475_v35  ;;  %vm510_vm4 = vweird.f32 %v475_v35  ;;  %v516_v54 = vand.u32 2147483648, %v475_v35  ;;  %v514_v58 = vand.u32 2147483647, %v475_v35 }
 0x1b3   : > { %v466_v36 = vpop.xlane.xlu0 %465  ;;  %v517_v63 = vor.u32 1.1754944e-38, %v516_v54  ;;  %vm515_vm9 = vcmp.eq.f32.partialorder %v514_v58, 8.507059e+37 }
 0x1b4   : > { %v1184_v38 = vmax.f32 %v466_v36, 1.0  ;;  %v819_v39 = vpop.eup %818 }
 0x1b5   : > { %v478_v42 = vmul.f32 %v819_v39, %v473_v34  ;;  %vm483_vm3 = vweird.f32 %v819_v39 }
 0x1b6   : > { %v472_v37 = vpop.xlane.xlu1 %471  ;;  %822 = vrcp.f32 %v1184_v38  ;;  %vm1198_vm6 = vmor %vm482_vm2, %vm483_vm3  ;;  %vm496_vm10 = vweird.f32 %v1184_v38  ;;  %v500_v8 = vand.u32 2147483647, %v1184_v38  ;;  %v502_v9 = vand.u32 2147483648, %v1184_v38 }
 0x1b7   : > { %v368_v28 = vpop.f32.mrf.mxu0  ;;  %v397_v29 = vpop.f32.mrf.mxu1  ;;  %v1186_v40 = vmax.f32 %v472_v37, 1.0  ;;  %v479_v44 = vsub.f32 1.0, %v478_v42 }
 0x1b8   : > { %707 = vmatmul.msk.f32.vlgmr.msra.gmra.mxu2 %vm344_vm1, %v368_v28  ;;  %709 = vmatmul.msk.f32.vlgmr.msra.gmra.mxu3 %vm344_vm1, %v397_v29  ;;  %v821_v41 = vpop.eup %820  ;;  %vm501_vm3 = vcmp.eq.f32.partialorder %v500_v8, 8.507059e+37  ;;  %v503_v20 = vor.u32 1.1754944e-38, %v502_v9 }
 0x1b9   : > { %824 = vrcp.f32 %v1186_v40  ;;  %v506_v43 = vmul.f32 %v821_v41, %v475_v35  ;;  %v480_v48 = vmul.f32 %v819_v39, %v479_v44  ;;  %vm511_vm5 = vweird.f32 %v821_v41 }
 0x1ba   : > { %vm512_vm7 = vmor %vm510_vm4, %vm511_vm5  ;;  %vm524_vm12 = vweird.f32 %v1186_v40  ;;  %v530_v10 = vand.u32 2147483648, %v1186_v40  ;;  %v528_v15 = vand.u32 2147483647, %v1186_v40 }
 0x1bb   : > { %v507_v45 = vsub.f32 1.0, %v506_v43  ;;  %v481_v52 = vadd.f32 %v819_v39, %v480_v48 }
 0x1bc   : > { %v1190_v46 = vpop.eup %822  ;;  %v531_v21 = vor.u32 1.1754944e-38, %v530_v10  ;;  %vm529_vm4 = vcmp.eq.f32.partialorder %v528_v15, 8.507059e+37 }
 0x1bd   : > { %v492_v49 = vmul.f32 %v1190_v46, %v1184_v38  ;;  %v508_v50 = vmul.f32 %v821_v41, %v507_v45  ;;  %v485_v61 = vsel %vm1198_vm6, %v819_v39, %v481_v52  ;;  %vm497_vm11 = vweird.f32 %v1190_v46 }
 0x1be   : > { %v490_v3 = vsel %vm487_vm8, %v489_v62, %v485_v61  ;;  %vm1214_vm14 = vmor %vm496_vm10, %vm497_vm11 }
 0x1bf   : > { %v371_v30 = vpop.f32.mrf.mxu0  ;;  %v400_v31 = vpop.f32.mrf.mxu1  ;;  %v509_v57 = vadd.f32 %v821_v41, %v508_v50  ;;  %v493_v59 = vsub.f32 1.0, %v492_v49 }
 0x1c0   : > { %708 = vmatmul.msk.f32.gmra.mxu2 %vm344_vm1, %v371_v30  ;;  %710 = vmatmul.msk.f32.gmra.mxu3 %vm344_vm1, %v400_v31  ;;  %v1192_v47 = vpop.eup %824 }
 0x1c1   : > { %v520_v51 = vmul.f32 %v1192_v47, %v1186_v40  ;;  %v513_v0 = vsel %vm512_vm7, %v821_v41, %v509_v57  ;;  %v494_v1 = vmul.f32 %v1190_v46, %v493_v59  ;;  %vm525_vm13 = vweird.f32 %v1192_v47 }
 0x1c2   : > { %v518_v4 = vsel %vm515_vm9, %v517_v63, %v513_v0  ;;  %vm1220_vm0 = vmor %vm524_vm12, %vm525_vm13 }
 0x1c3   : > { %v521_v60 = vsub.f32 1.0, %v520_v51  ;;  %v495_v7 = vadd.f32 %v1190_v46, %v494_v1 }
 0x1c5   : > { %v522_v2 = vmul.f32 %v1192_v47, %v521_v60  ;;  %v499_v19 = vsel %vm1214_vm14, %v1190_v46, %v495_v7 }
 0x1c6   : > { %v504_v26 = vsel %vm501_vm3, %v503_v20, %v499_v19 }
 0x1c7   : > { %v523_v14 = vadd.f32 %v1192_v47, %v522_v2 }
 0x1c9   : > { %v527_v24 = vsel %vm1220_vm0, %v1192_v47, %v523_v14 }
 0x1ca   : > { %v532_v28 = vsel %vm529_vm4, %v531_v21, %v527_v24 }
 0x23b   : > { %v426_v5 = vpop.f32.mrf.mxu2  ;;  %v455_v6 = vpop.f32.mrf.mxu3 }
 0x23c   : > { %v533_v11 = vmul.f32 %v490_v3, %v426_v5  ;;  %v535_v12 = vmul.f32 %v518_v4, %v455_v6 }
 0x23e   : > { %vm537_vm1 = vcmp.gt.f32.partialorder %v533_v11, 0.0  ;;  %v541_v17 = vmul.f32 0.01, %v533_v11  ;;  %vm539_vm2 = vcmp.gt.f32.partialorder %v535_v12, 0.0  ;;  %v543_v18 = vmul.f32 0.01, %v535_v12 }
 0x240   : > { %v545_v22 = vsel %vm537_vm1, %v533_v11, %v541_v17  ;;  %v547_v23 = vsel %vm539_vm2, %v535_v12, %v543_v18 }
 0x241   : > { %550 = vst.msk [vmem:[%s1150_s26] sm:$0xff] %vm549_vm15, %v545_v22 }
 0x242   : > { %552 = vst.msk [vmem:[%s1150_s26 + $0x10] sm:$0xff] %vm549_vm15, %v547_v23 }
 0x243   : > { %v429_v25 = vpop.f32.mrf.mxu2  ;;  %v458_v27 = vpop.f32.mrf.mxu3 }
 0x244   : > { %v534_v29 = vmul.f32 %v504_v26, %v429_v25  ;;  %v536_v30 = vmul.f32 %v532_v28, %v458_v27 }
 0x246   : > { %vm538_vm5 = vcmp.gt.f32.partialorder %v534_v29, 0.0  ;;  %v542_v31 = vmul.f32 0.01, %v534_v29  ;;  %vm540_vm6 = vcmp.gt.f32.partialorder %v536_v30, 0.0  ;;  %v544_v32 = vmul.f32 0.01, %v536_v30 }
 0x248   : > { %v546_v33 = vsel %vm538_vm5, %v534_v29, %v542_v31  ;;  %v548_v34 = vsel %vm540_vm6, %v536_v30, %v544_v32 }
 0x249   : > { %551 = vst.msk [vmem:[%s1150_s26 + $0x8] sm:$0xff] %vm549_vm15, %v546_v33 }
 0x24a   : > { %553 = vst.msk [vmem:[%s1150_s26 + $0x18] sm:$0xff] %vm549_vm15, %v548_v34 }
 0x24b   : > { %943 = shalt.err (!%p940_p4)
}
 0x24c   : > { %s1009_s10 = smov 128   ;;  %s1010_s26 = smov 8  }
 0x24d   : > { %740 = dma.vmem_to_hbm [thread:$0]  (%p1113_p2), %s571_s15, 512, %s1240_s28, %s555_s29, %s1009_s10, %s1009_s10, %s1010_s26  }
 0x24e PF: > { %s587_s20 = sand.u32 1, %s982_s12   ;;  %p754_p6 = pnand %p688_p10, %p1078_p5 }
 0x24f   : > { %s588_s21 = scalar_lea.sflag [#allocation5], %s587_s20 }
 0x250   : > { %p755_p8 = pneg %p754_p6 }
 0x252   : > { %977 = dma.done.wait (%p755_p8), %s588_s21, 512  }
 0x253   : > { %979 = vsyncadd (%p755_p8), %s588_s21, 4294966784  ;;  %s20_s17 = sadd.s32 1, %s1002_s17   ;;  %s1297_s12 = smov %s986_s13 }
 0x254   : > { %p17_p9 = scmp.ge.s32.totalorder %s20_s17, 4   ;;  %s1298_s13 = smov %s990_s14 }
 0x255   : > { %s1299_s14 = smov %s1123_s25  ;;  %s1300_s15 = smov %s998_s16 }
 0x256   : > { %s1301_s16 = smov %s1303_s9  ;;  %19 = sbr.rel (!%p17_p9) target bundleno = 7 (0x7), region = 92 }
 0x25b   :  { %594 = vsyncpa [#allocation4], 1 }
 0x25c   :  { %596 = vsyncpa [#allocation4 + $0x1], 1 }
 0x25d   :  { %597 = vsyncpa [#allocation7], 1 }
 0x25e   :  { %598 = vsyncpa [#allocation5], 1 }
 0x25f   :  { %600 = vsyncpa [#allocation5 + $0x1], 1 }

</bundles_post_ra>
